<compile_context>
chip_gen: v6e
topology: v6e:2x2x1
jax: 0.10.0
libtpu: 0.0.40
codegen_flags: <defaults>
</compile_context>

<pallas_src>
import functools

import jax
import jax.numpy as jnp
from jax.experimental import pallas as pl
from jax.experimental.pallas import tpu as pltpu


def _layernorm_kernel(x_ref, g_ref, b_ref, o_ref, *, eps):
    # x_ref: (NB, C, TP) block — channels on sublanes, pixels on lanes.
    x = x_ref[...].astype(jnp.float32)                          # (NB, C, TP)
    mean = jnp.mean(x, axis=1, keepdims=True)                   # (NB, 1, TP)
    centered = x - mean
    var = jnp.mean(centered * centered, axis=1, keepdims=True)  # unbiased=False
    # PyTorch adds eps to std OUTSIDE the sqrt.  Exact reciprocal on the
    # (NB, 1, TP) row only — C-fold less EUP traffic than a full-tile divide
    # and stays within 1e-5 of the reference.
    inv = 1.0 / (jnp.sqrt(var) + eps)                           # (NB, 1, TP)
    # g_ref/b_ref are (C, 1): broadcast over batch sub-block and lanes.
    y = centered * inv * g_ref[...] + b_ref[...]
    o_ref[...] = y.astype(o_ref.dtype)


def layer_norm(x, g, b, *, eps=1e-5,
               target_block_bytes=2 * 1024 * 1024,
               vmem_limit_bytes=48 * 1024 * 1024):
    """Channel LayerNorm matching the PyTorch module.

    x: (N, C, H, W); g, b: (1, C, 1, 1)   ->  (N, C, H, W)
    """
    N, C, H, W = x.shape
    HW = H * W
    itemsize = jnp.dtype(x.dtype).itemsize

    # Free, contiguous reshape so pixels land on the 128-lane axis.
    x_flat = x.reshape(N, C, HW)
    g_flat = g.reshape(C, 1)
    b_flat = b.reshape(C, 1)

    # --- Block sizing: target ~target_block_bytes of payload per grid step ---
    bytes_per_image = C * HW * itemsize
    if bytes_per_image >= target_block_bytes:
        # One (part of an) image per step: split H*W into lane tiles.
        nb = 1
        tp_elems = max(128, target_block_bytes // max(1, C * itemsize))
        tp = (tp_elems // 128) * 128
        if tp >= HW:
            tp = HW            # full last dim is always a legal block extent
    else:
        # Whole image per step; batch several images to reach the byte target.
        tp = HW
        nb = int(max(1, target_block_bytes // max(1, bytes_per_image)))
        nb = min(nb, N)

    grid_n = pl.cdiv(N, nb)
    grid_p = pl.cdiv(HW, tp)

    # Megacore (v7x has 2 TensorCores): make sure a non-trivial problem has at
    # least 2 parallel grid steps, as long as each half still moves >=~0.5 MiB.
    min_split_bytes = 512 * 1024
    total_bytes = N * C * HW * itemsize
    if grid_n * grid_p < 2 and total_bytes >= 2 * min_split_bytes:
        if N >= 2:
            nb = pl.cdiv(N, 2)
        elif HW >= 256:
            tp = ((pl.cdiv(HW, 2) + 127) // 128) * 128
        grid_n = pl.cdiv(N, nb)
        grid_p = pl.cdiv(HW, tp)

    grid = (grid_n, grid_p)

    out = pl.pallas_call(
        functools.partial(_layernorm_kernel, eps=eps),
        out_shape=jax.ShapeDtypeStruct((N, C, HW), x.dtype),
        grid_spec=pltpu.PrefetchScalarGridSpec(
            num_scalar_prefetch=0,
            grid=grid,
            in_specs=[
                pl.BlockSpec((nb, C, tp), lambda n, p: (n, 0, p)),
                pl.BlockSpec((C, 1), lambda n, p: (0, 0)),   # g: never re-DMA'd
                pl.BlockSpec((C, 1), lambda n, p: (0, 0)),   # b: never re-DMA'd
            ],
            out_specs=pl.BlockSpec((nb, C, tp), lambda n, p: (n, 0, p)),
        ),
        compiler_params=pltpu.CompilerParams(
            dimension_semantics=("parallel", "parallel"),
            vmem_limit_bytes=vmem_limit_bytes),
    )(x_flat, g_flat, b_flat)

    return out.reshape(N, C, H, W)


def _reference(x, g, b, eps=1e-5):
    """Pure-JAX mirror of the PyTorch forward."""
    mean = jnp.mean(x, axis=1, keepdims=True)
    var = jnp.mean((x - mean) ** 2, axis=1, keepdims=True)   # unbiased=False
    std = jnp.sqrt(var)
    return (x - mean) / (std + eps) * g + b


if __name__ == "__main__":
    key = jax.random.PRNGKey(0)
    k_x, k_g, k_b = jax.random.split(key, 3)

    N, C, H, W = 2, 4, 16, 16
    eps = 1e-5

    x = jax.random.normal(k_x, (N, C, H, W), dtype=jnp.float32)
    # Module init is g=ones, b=zeros; perturb so scale/shift are exercised
    # (still deterministic from PRNGKey(0)).
    g = 1.0 + 0.1 * jax.random.normal(k_g, (1, C, 1, 1), dtype=jnp.float32)
    b = 0.1 * jax.random.normal(k_b, (1, C, 1, 1), dtype=jnp.float32)

    y = layer_norm(x, g, b, eps=eps)
    y = jax.block_until_ready(y)

    y_ref = _reference(x, g, b, eps=eps)
    assert y.shape == (N, C, H, W), y.shape
    max_err = float(jnp.max(jnp.abs(y - y_ref)))
    assert jnp.allclose(y, y_ref, atol=1e-5, rtol=1e-5), max_err

    print("KERNEL_OK")
</pallas_src>

<mosaic_0001>
module attributes {stable_mosaic.version = 11 : i64} {
  func.func @_layernorm_kernel(%arg0: i32, %arg1: i32, %arg2: memref<2x4x256xf32, #tpu.memory_space<vmem>>, %arg3: memref<4x1xf32, #tpu.memory_space<vmem>>, %arg4: memref<4x1xf32, #tpu.memory_space<vmem>>, %arg5: memref<2x4x256xf32, #tpu.memory_space<vmem>>) attributes {dimension_semantics = [#tpu.dimension_semantics<parallel>, #tpu.dimension_semantics<parallel>], iteration_bounds = array<i64: 1, 1>, scalar_prefetch = 0 : i64, scratch_operands = 0 : i64, tpu.core_type = #tpu.core_type<tc>, window_params = [{transform_indices = @transform_0, window_bounds = array<i64: 2, 4, 256>}, {pipeline_mode = #tpu.pipeline_mode<synchronous>, transform_indices = @transform_1, window_bounds = array<i64: 4, 1>}, {pipeline_mode = #tpu.pipeline_mode<synchronous>, transform_indices = @transform_2, window_bounds = array<i64: 4, 1>}, {transform_indices = @transform_3, window_bounds = array<i64: 2, 4, 256>}]} {
    %c0 = arith.constant 0 : index
    %c0_0 = arith.constant 0 : index
    %c0_1 = arith.constant 0 : index
    %0 = vector.load %arg2[%c0, %c0_0, %c0_1] : memref<2x4x256xf32, #tpu.memory_space<vmem>>, vector<2x4x256xf32>
    %cst = arith.constant dense<0.000000e+00> : vector<2x256xf32>
    %1 = vector.multi_reduction <add>, %0, %cst [1] : vector<2x4x256xf32> to vector<2x256xf32>
    %2 = vector.shape_cast %1 : vector<2x256xf32> to vector<2x1x256xf32>
    %cst_2 = arith.constant 4.000000e+00 : f32
    %3 = vector.broadcast %cst_2 : f32 to vector<2x1x256xf32>
    %4 = arith.divf %2, %3 : vector<2x1x256xf32>
    %5 = vector.broadcast %4 : vector<2x1x256xf32> to vector<2x4x256xf32>
    %6 = arith.subf %0, %5 : vector<2x4x256xf32>
    %7 = arith.mulf %6, %6 : vector<2x4x256xf32>
    %cst_3 = arith.constant dense<0.000000e+00> : vector<2x256xf32>
    %8 = vector.multi_reduction <add>, %7, %cst_3 [1] : vector<2x4x256xf32> to vector<2x256xf32>
    %9 = vector.shape_cast %8 : vector<2x256xf32> to vector<2x1x256xf32>
    %cst_4 = arith.constant 4.000000e+00 : f32
    %10 = vector.broadcast %cst_4 : f32 to vector<2x1x256xf32>
    %11 = arith.divf %9, %10 : vector<2x1x256xf32>
    %12 = math.sqrt %11 : vector<2x1x256xf32>
    %cst_5 = arith.constant 9.99999974E-6 : f32
    %13 = vector.broadcast %cst_5 : f32 to vector<2x1x256xf32>
    %14 = arith.addf %12, %13 : vector<2x1x256xf32>
    %cst_6 = arith.constant 1.000000e+00 : f32
    %15 = vector.broadcast %cst_6 : f32 to vector<2x1x256xf32>
    %16 = arith.divf %15, %14 : vector<2x1x256xf32>
    %17 = vector.broadcast %16 : vector<2x1x256xf32> to vector<2x4x256xf32>
    %18 = arith.mulf %6, %17 : vector<2x4x256xf32>
    %c0_7 = arith.constant 0 : index
    %c0_8 = arith.constant 0 : index
    %19 = vector.load %arg3[%c0_7, %c0_8] : memref<4x1xf32, #tpu.memory_space<vmem>>, vector<4x1xf32>
    %20 = vector.shape_cast %19 : vector<4x1xf32> to vector<1x4x1xf32>
    %21 = vector.broadcast %20 : vector<1x4x1xf32> to vector<2x4x256xf32>
    %22 = arith.mulf %18, %21 : vector<2x4x256xf32>
    %c0_9 = arith.constant 0 : index
    %c0_10 = arith.constant 0 : index
    %23 = vector.load %arg4[%c0_9, %c0_10] : memref<4x1xf32, #tpu.memory_space<vmem>>, vector<4x1xf32>
    %24 = vector.shape_cast %23 : vector<4x1xf32> to vector<1x4x1xf32>
    %25 = vector.broadcast %24 : vector<1x4x1xf32> to vector<2x4x256xf32>
    %26 = arith.addf %22, %25 : vector<2x4x256xf32>
    %c0_11 = arith.constant 0 : index
    %c0_12 = arith.constant 0 : index
    %c0_13 = arith.constant 0 : index
    %27 = vector.load %arg5[%c0_11, %c0_12, %c0_13] : memref<2x4x256xf32, #tpu.memory_space<vmem>>, vector<2x4x256xf32>
    tpu.vector_store %arg5[%c0_11, %c0_12, %c0_13], %26 {strides = array<i32>} : memref<2x4x256xf32, #tpu.memory_space<vmem>>, vector<2x4x256xf32>,
    return
  }
  func.func @transform_0(%arg0: i32, %arg1: i32) -> (i32, i32, i32) {
    %c0_i32 = arith.constant 0 : i32
    %c0_i32_0 = arith.constant 0 : i32
    return %arg0, %c0_i32, %arg1 : i32, i32, i32
  }
  func.func @transform_1(%arg0: i32, %arg1: i32) -> (i32, i32) {
    %c0_i32 = arith.constant 0 : i32
    %c0_i32_0 = arith.constant 0 : i32
    %c0_i32_1 = arith.constant 0 : i32
    return %c0_i32, %c0_i32_0 : i32, i32
  }
  func.func @transform_2(%arg0: i32, %arg1: i32) -> (i32, i32) {
    %c0_i32 = arith.constant 0 : i32
    %c0_i32_0 = arith.constant 0 : i32
    %c0_i32_1 = arith.constant 0 : i32
    return %c0_i32, %c0_i32_0 : i32, i32
  }
  func.func @transform_3(%arg0: i32, %arg1: i32) -> (i32, i32, i32) {
    %c0_i32 = arith.constant 0 : i32
    %c0_i32_0 = arith.constant 0 : i32
    return %arg0, %c0_i32, %arg1 : i32, i32, i32
  }
}

</mosaic_0001>

<bundles_post_ra>
// kernel: tpu_custom_call.1
= control target key start
LH: loop header
LB: loop body
LE: loop exit
PB: predicated region body
PF: predicated region fallthrough
CT: control target
= control target key end

     0   :  { %8 = vsyncpa [#allocation3], 0  ;;  %s351_s0 = inlined_call_operand.hbm [shape: f32[2,4,256], index: 0, kind: input, shape index: {}]   ;;  %s352_s1 = inlined_call_operand.vmem [shape: f32[4,1], index: 1, kind: input, shape index: {}]   ;;  %s353_s2 = inlined_call_operand.vmem [shape: f32[4,1], index: 2, kind: input, shape index: {}]   ;;  %s354_s3 = inlined_call_operand.hbm [shape: f32[2,4,256], index: 3, kind: output, shape index: {}]  }
   0x1   :  { %9 = vsyncpa [#allocation4], 0  ;;  %s289_s12 = smov [#allocation2]  }
   0x2   :  { %s15_s13 = sshll.u32 %s289_s12, 4  ;;  %s16_s13 = int_to_ptr.vmem [resolvable:$true] %s15_s13 }
   0x3   :  { %s253_s14 = scalar_lea.vmem %s16_s13, 256  ;;  %p258_p1 = scmp.lt.s32.totalorder %s16_s13, %s16_s13 }
   0x4   :  { %p254_p0 = scmp.ne.s32.totalorder %s16_s13, %s253_s14  ;;  %p259_p2 = scmp.lt.s32.totalorder %s253_s14, %s253_s14 }
   0x6   :  { %p260_p3 = por %p259_p2, %p258_p1 }
   0x8   :  { %p261_p4 = pnand %p260_p3, %p254_p0 }
   0xa   :  { %264 = shalt.err (!%p261_p4)
}
   0xb   :  { %s290_s15 = smov 128   ;;  %s291_s16 = smov 8  }
   0xc   :  { %21 = dma.hbm_to_vmem [thread:$0]  %s351_s0, 256, %s16_s13, [#allocation3], %s290_s15, %s290_s15, %s291_s16  }
   0xd   :  { %285 = dma.done.wait [#allocation3], 256  }
   0xe   :  { %286 = vsyncadd [#allocation3], 4294967040  ;;  %v292_v0 = vmov 0   ;;  %vm37_vm0 = vcmask 1043456   ;;  %v171_v1 = vld [vmem:[%s352_s1] sm:$0xf] }
   0xf   :  { %226 = vset.pattern.permute.xlu0 %v292_v0  ;;  %v29_v2 = vld [vmem:[#allocation2] sm:$0xff]  ;;  %v30_v3 = vld [vmem:[#allocation2 + $0x8] sm:$0xff]  ;;  %s294_s0 = smov [#allocation5]  }
  0x10   :  { %174 = vperm.xlu0 %226, %v171_v1   ;;  %v33_v4 = vcombine.high %v29_v2, %v29_v2  ;;  %v38_v5 = vsel %vm37_vm0, %v29_v2, 0.0  ;;  %v186_v6 = vld [vmem:[%s353_s2] sm:$0xf]  ;;  %v34_v7 = vcombine.high %v30_v3, %v30_v3  ;;  %v52_v9 = vsel %vm37_vm0, %v30_v3, 0.0  ;;  %s208_s1 = sshll.u32 %s294_s0, 4  ;;  %s209_s1 = int_to_ptr.vmem [resolvable:$true] %s208_s1 }
  0x11   :  { %v39_v8 = vrot.slane %v38_v5, 4  ;;  %v53_v11 = vrot.slane %v52_v9, 4  ;;  %s265_s2 = scalar_lea.vmem %s209_s1, 256  ;;  %p270_p6 = scmp.lt.s32.totalorder %s209_s1, %s209_s1 }
  0x12   :  { %v45_v10 = vsel %vm37_vm0, %v33_v4, 0.0  ;;  %v59_v14 = vsel %vm37_vm0, %v34_v7, 0.0  ;;  %p266_p5 = scmp.ne.s32.totalorder %s209_s1, %s265_s2  ;;  %p271_p7 = scmp.lt.s32.totalorder %s265_s2, %s265_s2 }
  0x13   :  { %v40_v12 = vadd.f32 %v39_v8, %v38_v5  ;;  %v46_v13 = vrot.slane %v45_v10, 4  ;;  %v54_v15 = vadd.f32 %v53_v11, %v52_v9  ;;  %v60_v16 = vrot.slane %v59_v14, 4 }
  0x14   :  { %189 = vperm.xlu0 %226, %v186_v6   ;;  %p272_p8 = por %p271_p7, %p270_p6 }
  0x15   :  { %v47_v17 = vadd.f32 %v46_v13, %v45_v10  ;;  %v41_v18 = vrot.slane %v40_v12, 2  ;;  %v61_v19 = vadd.f32 %v60_v16, %v59_v14  ;;  %v55_v21 = vrot.slane %v54_v15, 2 }
  0x16   :  { %p273_p9 = pnand %p272_p8, %p266_p5 }
  0x17   :  { %v48_v20 = vrot.slane %v47_v17, 2  ;;  %v62_v22 = vrot.slane %v61_v19, 2  ;;  %v42_v23 = vadd.f32 %v41_v18, %v40_v12  ;;  %v56_v25 = vadd.f32 %v55_v21, %v54_v15 }
  0x19   :  { %v49_v24 = vadd.f32 %v48_v20, %v47_v17  ;;  %v63_v26 = vadd.f32 %v62_v22, %v61_v19  ;;  %v43_v27 = vrot.slane %v42_v23, 1  ;;  %v57_v29 = vrot.slane %v56_v25, 1 }
  0x1b   :  { %v50_v28 = vrot.slane %v49_v24, 1  ;;  %v64_v30 = vrot.slane %v63_v26, 1  ;;  %v44_v31 = vadd.f32 %v43_v27, %v42_v23  ;;  %v58_v33 = vadd.f32 %v57_v29, %v56_v25 }
  0x1d   :  { %v51_v32 = vadd.f32 %v50_v28, %v49_v24  ;;  %v65_v34 = vadd.f32 %v64_v30, %v63_v26  ;;  %v67_v35 = vmul.f32 0.25, %v44_v31  ;;  %v69_v37 = vmul.f32 0.25, %v58_v33 }
  0x1f   :  { %v68_v36 = vmul.f32 0.25, %v51_v32  ;;  %v70_v38 = vmul.f32 0.25, %v65_v34 }
  0x21   :  { %v75_v39 = vcombine.low %v67_v35, %v68_v36  ;;  %v76_v40 = vcombine.low %v69_v37, %v70_v38 }
  0x23   :  { %v331_v41 = vsub.f32 %v29_v2, %v75_v39  ;;  %v333_v42 = vsub.f32 %v30_v3, %v76_v40  ;;  %v293_v39 = vmov 839922192  }
  0x24   :  { %v177_v40 = vunpack.c.l.s4 %v293_v39 }
  0x25   :  { %v81_v43 = vmul.f32 %v331_v41, %v331_v41  ;;  %v82_v44 = vmul.f32 %v333_v42, %v333_v42 }
  0x27   :  { %v85_v45 = vcombine.high %v81_v43, %v81_v43  ;;  %v86_v46 = vcombine.high %v82_v44, %v82_v44  ;;  %v89_v47 = vsel %vm37_vm0, %v81_v43, 0.0  ;;  %v103_v48 = vsel %vm37_vm0, %v82_v44, 0.0 }
  0x28   :  { %v90_v50 = vrot.slane %v89_v47, 4  ;;  %v104_v52 = vrot.slane %v103_v48, 4  ;;  %v179_v43 = vlaneseq }
  0x29   :  { %v96_v49 = vsel %vm37_vm0, %v85_v45, 0.0  ;;  %v110_v51 = vsel %vm37_vm0, %v86_v46, 0.0 }
  0x2a   :  { %v97_v53 = vrot.slane %v96_v49, 4  ;;  %v111_v54 = vrot.slane %v110_v51, 4  ;;  %v91_v55 = vadd.f32 %v90_v50, %v89_v47  ;;  %v105_v56 = vadd.f32 %v104_v52, %v103_v48 }
  0x2b   :  { %v178_v47 = vunpack.c.0.s8 %v177_v40  ;;  %v180_v48 = vshrl.u32 %v179_v43, 7 }
  0x2c   :  { %v98_v57 = vadd.f32 %v97_v53, %v96_v49  ;;  %v112_v58 = vadd.f32 %v111_v54, %v110_v51  ;;  %v92_v59 = vrot.slane %v91_v55, 2  ;;  %v106_v60 = vrot.slane %v105_v56, 2 }
  0x2d   :  { %v181_v50 = vsub.s32 %v178_v47, %v180_v48 }
  0x2e   :  { %v99_v61 = vrot.slane %v98_v57, 2  ;;  %v113_v62 = vrot.slane %v112_v58, 2  ;;  %v93_v63 = vadd.f32 %v92_v59, %v91_v55  ;;  %v107_v0 = vadd.f32 %v106_v60, %v105_v56 }
  0x30   :  { %v100_v1 = vadd.f32 %v99_v61, %v98_v57  ;;  %v114_v2 = vadd.f32 %v113_v62, %v112_v58  ;;  %v94_v3 = vrot.slane %v93_v63, 1  ;;  %v108_v4 = vrot.slane %v107_v0, 1 }
  0x32   :  { %v101_v5 = vrot.slane %v100_v1, 1  ;;  %v115_v6 = vrot.slane %v114_v2, 1  ;;  %v95_v7 = vadd.f32 %v94_v3, %v93_v63  ;;  %v109_v8 = vadd.f32 %v108_v4, %v107_v0 }
  0x34   :  { %v102_v9 = vadd.f32 %v101_v5, %v100_v1  ;;  %v116_v10 = vadd.f32 %v115_v6, %v114_v2  ;;  %v117_v11 = vmul.f32 0.25, %v95_v7  ;;  %v119_v12 = vmul.f32 0.25, %v109_v8 }
  0x36   :  { %v118_v13 = vmul.f32 0.25, %v102_v9  ;;  %v120_v14 = vmul.f32 0.25, %v116_v10  ;;  %229 = vrsqrt.f32 %v117_v11  ;;  %vm123_vm1 = vcmp.eq.f32.partialorder %v117_v11, inf }
  0x37   :  { %231 = vrsqrt.f32 %v119_v12  ;;  %vm137_vm2 = vcmp.eq.f32.partialorder %v119_v12, inf  ;;  %v126_v22 = vand.u32 2147483648, %v117_v11  ;;  %vm125_vm4 = vcmp.eq.f32.partialorder %v117_v11, 0.0 }
  0x38   :  { %233 = vrsqrt.f32 %v118_v13  ;;  %vm130_vm3 = vcmp.eq.f32.partialorder %v118_v13, inf  ;;  %v140_v25 = vand.u32 2147483648, %v119_v12  ;;  %vm144_vm5 = vcmp.eq.f32.partialorder %v120_v14, inf }
  0x39   :  { %235 = vrsqrt.f32 %v120_v14  ;;  %v133_v26 = vand.u32 2147483648, %v118_v13  ;;  %vm139_vm6 = vcmp.eq.f32.partialorder %v119_v12, 0.0  ;;  %vm132_vm7 = vcmp.eq.f32.partialorder %v118_v13, 0.0 }
  0x3a   :  { %v147_v29 = vand.u32 2147483648, %v120_v14  ;;  %vm146_vm8 = vcmp.eq.f32.partialorder %v120_v14, 0.0 }
  0x43   :  { %v230_v15 = vpop.eup %229 }
  0x44   :  { %v232_v16 = vpop.eup %231  ;;  %v122_v19 = vmul.f32 %v230_v15, %v117_v11 }
  0x45   :  { %v234_v17 = vpop.eup %233  ;;  %v136_v20 = vmul.f32 %v232_v16, %v119_v12 }
  0x46   :  { %v236_v18 = vpop.eup %235  ;;  %v129_v21 = vmul.f32 %v234_v17, %v118_v13  ;;  %v124_v24 = vsel %vm123_vm1, %v117_v11, %v122_v19 }
  0x47   :  { %v143_v23 = vmul.f32 %v236_v18, %v120_v14  ;;  %v138_v27 = vsel %vm137_vm2, %v119_v12, %v136_v20  ;;  %v127_v30 = vsel %vm125_vm4, %v126_v22, %v124_v24 }
  0x48   :  { %v131_v28 = vsel %vm130_vm3, %v118_v13, %v129_v21  ;;  %v141_v32 = vsel %vm139_vm6, %v140_v25, %v138_v27  ;;  %v149_v35 = vadd.f32 1e-05, %v127_v30 }
  0x49   :  { %v145_v31 = vsel %vm144_vm5, %v120_v14, %v143_v23  ;;  %v134_v33 = vsel %vm132_vm7, %v133_v26, %v131_v28  ;;  %v151_v36 = vadd.f32 1e-05, %v141_v32 }
  0x4a   :  { %v148_v34 = vsel %vm146_vm8, %v147_v29, %v145_v31  ;;  %v150_v37 = vadd.f32 1e-05, %v134_v33  ;;  %237 = vrcp.f32 %v149_v35 }
  0x4b   :  { %v152_v38 = vadd.f32 1e-05, %v148_v34  ;;  %239 = vrcp.f32 %v151_v36 }
  0x4c   :  { %241 = vrcp.f32 %v150_v37 }
  0x4d   :  { %243 = vrcp.f32 %v152_v38 }
  0x57   :  { %v238_v44 = vpop.eup %237 }
  0x58   :  { %v240_v45 = vpop.eup %239 }
  0x59   :  { %v242_v46 = vpop.eup %241 }
  0x5a   :  { %v244_v49 = vpop.eup %243  ;;  %v165_v51 = vcombine.low %v238_v44, %v242_v46 }
  0x5b   :  { %v166_v52 = vcombine.low %v240_v45, %v244_v49 }
  0x5c   :  { %v169_v54 = vmul.f32 %v165_v51, %v331_v41 }
  0x5d   :  { %v170_v55 = vmul.f32 %v166_v52, %v333_v42 }
  0x8b   :  { %v175_v53 = vpop.permute.xlu0 %174 }
  0x8c   :  { %v182_v56 = vrot.slane %v175_v53, %v181_v50 }
  0x8e   :  { %v184_v58 = vmul.f32 %v182_v56, %v169_v54  ;;  %v185_v59 = vmul.f32 %v182_v56, %v170_v55 }
  0x8f   :  { %v190_v57 = vpop.permute.xlu0 %189 }
  0x90   :  { %v197_v60 = vrot.slane %v190_v57, %v181_v50 }
  0x92   :  { %v199_v61 = vadd.f32 %v197_v60, %v184_v58  ;;  %v200_v62 = vadd.f32 %v197_v60, %v185_v59 }
  0x94   :  { %201 = vst [vmem:[#allocation5] sm:$0xff] %v199_v61  ;;  %202 = vst [vmem:[#allocation5 + $0x8] sm:$0xff] %v200_v62 }
  0x95   :  { %276 = shalt.err (!%p273_p9)
}
  0x96   :  { %214 = dma.vmem_to_hbm [thread:$0]  %s209_s1, 256, %s354_s3, [#allocation4], %s290_s15, %s290_s15, %s291_s16  }
  0x97   :  { %287 = dma.done.wait [#allocation4], 256  }
  0x98   :  { %288 = vsyncadd [#allocation4], 4294967040 }
  0x99   :  { %218 = vsyncpa [#allocation3], 1 }
  0x9a   :  { %219 = vsyncpa [#allocation4], 1 }

</bundles_post_ra>
